<compile_context>
chip_gen: v7x
topology: tpu7x:2x2x1
jax: 0.10.0
libtpu: 0.0.40
codegen_flags: <defaults>
</compile_context>

<pallas_src>
import functools

import jax
import jax.numpy as jnp
from jax import lax
from jax.experimental import pallas as pl
from jax.experimental.pallas import tpu as pltpu

LN_EPS = 1e-5          # torch.nn.LayerNorm default eps
_LANE = 128
_MIB = 1024 * 1024


# --------------------------------------------------------------------------- #
# Kernel
# --------------------------------------------------------------------------- #
def tokenizer_kernel(p_valid, x_ref, wa_ref, wv_ref, g_ref, b_ref, o_ref):
    """One grid step processes Bt batch elements.

    x_ref : (Bt, C, Pp)  streamed feature map (Pp = P lane-padded to 128)
    wa_ref: (L, C)       W_a 1x1-conv weight
    wv_ref: (Ct, C)      W_v 1x1-conv weight
    g_ref : (1, Ct)      LayerNorm gamma
    b_ref : (1, Ct)      LayerNorm beta
    o_ref : (Bt, L, Ct)  lane-dense output (= LayerNorm(T^T))
    """
    bt, _, pp = x_ref.shape
    l = wa_ref.shape[0]
    ct = wv_ref.shape[0]
    wa = wa_ref[...]

    # Per-batch: logits -> masked softmax over P -> m = S @ X^T, stacked.
    m_rows = []
    for bi in range(bt):                               # static unroll (Bt small)
        x = x_ref[bi]                                  # (C, Pp)
        # A = W_a @ X   ("NN" matmul, f32 accumulation on the MXU)
        a = lax.dot_general(wa, x, (((1,), (0,)), ((), ())),
                            preferred_element_type=jnp.float32)      # (L, Pp)
        if pp != p_valid:                              # mask padded columns
            col = lax.broadcasted_iota(jnp.int32, a.shape, 1)
            a = jnp.where(col < p_valid, a, -jnp.inf)
        # softmax over the spatial axis (lane axis), f32 math.
        a_max = jnp.max(a, axis=-1, keepdims=True)
        e = jnp.exp(a - a_max)
        s = e / jnp.sum(e, axis=-1, keepdims=True)                    # (L, Pp)
        # m = S @ X^T : "NT" matmul (rhs contraction on its minor axis is the
        # MXU-native transposed-RHS form -> no vxpose of the big X tile).
        m_rows.append(
            lax.dot_general(s.astype(x.dtype), x, (((1,), (1,)), ((), ())),
                            preferred_element_type=jnp.float32))      # (L, C)
    m = m_rows[0] if bt == 1 else jnp.concatenate(m_rows, axis=0)     # (Bt*L, C)

    # T^T = M @ W_v^T : one fused "NT" matmul filling the MXU M dimension.
    t = lax.dot_general(m.astype(wv_ref.dtype), wv_ref[...],
                        (((1,), (1,)), ((), ())),
                        preferred_element_type=jnp.float32)           # (Bt*L, Ct)

    # LayerNorm over Ct (lane axis), f32 math, biased variance (torch default).
    mu = jnp.mean(t, axis=-1, keepdims=True)
    var = jnp.mean((t - mu) ** 2, axis=-1, keepdims=True)
    y = (t - mu) * lax.rsqrt(var + LN_EPS) * g_ref[...] + b_ref[...]

    # Lane-dense store; the (L,Ct)->(Ct,L) permute happens in the wrapper.
    o_ref[...] = y.reshape(bt, l, ct).astype(o_ref.dtype)


# --------------------------------------------------------------------------- #
# Wrapper helpers
# --------------------------------------------------------------------------- #
def _physical_vmem_bytes():
    try:
        return int(pltpu.get_tpu_info().vmem_capacity_bytes)
    except Exception:
        return 64 * _MIB          # conservative default = v7x per-core VMEM


def _choose_batch_block(batch, x_row_bytes, x_budget_bytes):
    """Largest Bt dividing `batch` s.t. the double-buffered X slab fits the
    budget and (for batch >= 2) the grid keeps >= 2 steps for megacore/DMA
    overlap."""
    best = 1
    for bt in range(1, min(batch, 16) + 1):
        if batch % bt:
            continue
        if batch >= 2 and batch // bt < 2:
            continue
        if 2 * bt * x_row_bytes > x_budget_bytes:
            continue
        best = bt
    return best


_WEIGHT_SINGLE_BUFFER_OK = None   # lazily probed: pipeline_mode=pl.Buffered(1)


def filter_based_tokenizer(x4d, params, *, stream_dtype=jnp.bfloat16):
    """x4d: (B, C, H, W) float feature map.  Returns (B, Ct, L) like the module."""
    global _WEIGHT_SINGLE_BUFFER_OK

    B, C, H, W = x4d.shape
    P = H * W
    L = params["wa"].shape[0]
    Ct = params["wv"].shape[0]

    # ---- wrapper-side layout prep: flatten, lane-pad P, cast streaming dtype
    Pp = -(-P // _LANE) * _LANE
    x = x4d.reshape(B, C, P).astype(stream_dtype)
    if Pp != P:
        x = jnp.pad(x, ((0, 0), (0, 0), (0, Pp - P)))     # masked in-kernel
    wa = params["wa"].astype(stream_dtype)
    wv = params["wv"].astype(stream_dtype)
    gamma = params["gamma"].astype(jnp.float32).reshape(1, Ct)
    beta = params["beta"].astype(jnp.float32).reshape(1, Ct)

    # ---- VMEM budget / batch-block size -------------------------------------
    itemsize = jnp.dtype(stream_dtype).itemsize
    vmem_cap = _physical_vmem_bytes()
    vmem_cap_limit = (vmem_cap * 3) // 4        # ~48 MiB on v7x, ~96 MiB v5e/v6e
    x_row_bytes = C * Pp * itemsize
    Bt = _choose_batch_block(B, x_row_bytes, vmem_cap_limit // 2)
    grid = (B // Bt,)

    footprint = (2 * Bt * x_row_bytes                        # double-buffered X
                 + 2 * Bt * max(L, 8) * max(Ct, _LANE) * 4   # double-buffered out
                 + 2 * (L * C + Ct * C) * itemsize           # weights (worst: 2x)
                 + 2 * 2 * max(Ct, _LANE) * 4)               # gamma / beta
    vmem_limit = int(min(vmem_cap_limit, max(16 * _MIB, footprint + 8 * _MIB)))

    kernel = functools.partial(tokenizer_kernel, P)

    def const_spec(shape, single_buffer):
        idx = lambda i: (0,) * len(shape)
        if single_buffer:
            # Grid-invariant operand: no point double-buffering it.
            return pl.BlockSpec(shape, idx, pipeline_mode=pl.Buffered(1))
        return pl.BlockSpec(shape, idx)

    def run(single_buffer_weights):
        return pl.pallas_call(
            kernel,
            out_shape=jax.ShapeDtypeStruct((B, L, Ct), jnp.float32),
            grid_spec=pltpu.PrefetchScalarGridSpec(
                num_scalar_prefetch=0,
                grid=grid,
                in_specs=[
                    pl.BlockSpec((Bt, C, Pp), lambda i: (i, 0, 0)),        # X
                    const_spec((L, C), single_buffer_weights),             # W_a
                    const_spec((Ct, C), single_buffer_weights),            # W_v
                    const_spec((1, Ct), single_buffer_weights),            # gamma
                    const_spec((1, Ct), single_buffer_weights),            # beta
                ],
                out_specs=pl.BlockSpec((Bt, L, Ct), lambda i: (i, 0, 0)),
            ),
            compiler_params=pltpu.CompilerParams(
                dimension_semantics=("parallel",),     # megacore shares batch
                vmem_limit_bytes=vmem_limit,
            ),
            cost_estimate=pl.CostEstimate(
                flops=2 * B * (L * C * Pp + L * C * Pp + L * C * Ct),
                transcendentals=B * L * Pp,
                bytes_accessed=(x.size + wa.size + wv.size) * itemsize
                + (gamma.size + beta.size + B * L * Ct) * 4,
            ),
        )(x, wa, wv, gamma, beta)

    if _WEIGHT_SINGLE_BUFFER_OK is None:
        try:   # probe Buffered(1) support once; fall back to default buffering
            out_llc = jax.block_until_ready(run(True))
            _WEIGHT_SINGLE_BUFFER_OK = True
        except Exception:
            _WEIGHT_SINGLE_BUFFER_OK = False
            out_llc = run(False)
    else:
        out_llc = run(_WEIGHT_SINGLE_BUFFER_OK)

    # Module output layout is (B, Ct, L); the tiny permute is done by XLA.
    return jnp.swapaxes(out_llc, 1, 2)


# --------------------------------------------------------------------------- #
# Params / reference
# --------------------------------------------------------------------------- #
def make_params(key, feature_map_cs, visual_tokens_cs, n_visual_tokens):
    k0, k1, k2, k3 = jax.random.split(key, 4)
    scale = 0.05
    return {
        # 1x1 Conv1d weights (out_channels, in_channels), bias=False
        "wa": scale * jax.random.normal(
            k0, (n_visual_tokens, feature_map_cs), jnp.float32),
        "wv": scale * jax.random.normal(
            k1, (visual_tokens_cs, feature_map_cs), jnp.float32),
        # LayerNorm(visual_tokens_cs) affine; perturbed from the PyTorch
        # defaults (1, 0) so the test exercises them.
        "gamma": 1.0 + 0.1 * jax.random.normal(
            k2, (1, visual_tokens_cs), jnp.float32),
        "beta": 0.1 * jax.random.normal(
            k3, (1, visual_tokens_cs), jnp.float32),
    }


def filter_based_tokenizer_ref(x4d, p):
    """Pure-JAX reference mirroring the PyTorch forward structure exactly."""
    B, C, H, W = x4d.shape
    X = x4d.reshape(B, C, H * W)                                  # (B, C, P)
    A = jnp.einsum("lc,bcp->blp", p["wa"], X)                     # W_a 1x1 conv
    V = jnp.einsum("tc,bcp->btp", p["wv"], X)                     # W_v 1x1 conv
    attn = jnp.swapaxes(jax.nn.softmax(A, axis=2), 1, 2)          # (B, P, L)
    T = jnp.einsum("btp,bpl->btl", V, attn)                       # (B, Ct, L)
    Tl = jnp.swapaxes(T, 1, 2)                                    # (B, L, Ct)
    mu = jnp.mean(Tl, -1, keepdims=True)
    var = jnp.mean((Tl - mu) ** 2, -1, keepdims=True)
    Y = (Tl - mu) / jnp.sqrt(var + LN_EPS) * p["gamma"] + p["beta"]
    return jnp.swapaxes(Y, 1, 2)                                  # (B, Ct, L)


def quantize_inputs(x4d, p, dtype):
    """Mirror the wrapper's streaming quantization (for test tolerances)."""
    q = lambda a: a.astype(dtype).astype(jnp.float32)
    return q(x4d), dict(p, wa=q(p["wa"]), wv=q(p["wv"]))


# --------------------------------------------------------------------------- #
# Demo / self-test
# --------------------------------------------------------------------------- #
if __name__ == "__main__":
    B = 2
    feature_map_cs = 32       # C
    H = W = 16                # P = 256 (lane-aligned)
    visual_tokens_cs = 128    # Ct (module default 1024; small for the demo)
    n_visual_tokens = 8       # L  (module default)

    key = jax.random.PRNGKey(0)
    kx, kp, kx2 = jax.random.split(key, 3)
    x = jax.random.normal(kx, (B, feature_map_cs, H, W), jnp.float32)
    params = make_params(kp, feature_map_cs, visual_tokens_cs, n_visual_tokens)

    # 1) f32 streaming path: tight check against the pure-JAX reference.
    out32 = jax.block_until_ready(
        filter_based_tokenizer(x, params, stream_dtype=jnp.float32))
    ref32 = filter_based_tokenizer_ref(x, params)
    assert out32.shape == (B, visual_tokens_cs, n_visual_tokens)
    assert jnp.allclose(out32, ref32, atol=5e-4, rtol=5e-4), "f32 path mismatch"

    # 2) default bf16 streaming path (perf config): compare against the
    #    reference evaluated on the same bf16-quantized inputs.
    out16 = jax.block_until_ready(filter_based_tokenizer(x, params))
    xq, pq = quantize_inputs(x, params, jnp.bfloat16)
    ref16 = filter_based_tokenizer_ref(xq, pq)
    assert jnp.allclose(out16, ref16, atol=2e-2, rtol=2e-2), "bf16 path mismatch"

    # 3) ragged spatial size (P=25 -> padded & masked to 128) and a multi-batch
    #    block per grid step (B=4 -> Bt=2, grid=2).
    x2 = jax.random.normal(kx2, (4, feature_map_cs, 5, 5), jnp.float32)
    out2 = jax.block_until_ready(filter_based_tokenizer(x2, params))
    x2q, _ = quantize_inputs(x2, params, jnp.bfloat16)
    ref2 = filter_based_tokenizer_ref(x2q, pq)
    assert out2.shape == (4, visual_tokens_cs, n_visual_tokens)
    assert jnp.allclose(out2, ref2, atol=2e-2, rtol=2e-2), "padded path mismatch"

    print("KERNEL_OK")
</pallas_src>

<mosaic_0001>
module attributes {stable_mosaic.version = 11 : i64} {
  func.func @tokenizer_kernel(%arg0: i32, %arg1: memref<1x32x256xf32, #tpu.memory_space<vmem>>, %arg2: memref<8x32xf32, #tpu.memory_space<vmem>>, %arg3: memref<128x32xf32, #tpu.memory_space<vmem>>, %arg4: memref<1x128xf32, #tpu.memory_space<vmem>>, %arg5: memref<1x128xf32, #tpu.memory_space<vmem>>, %arg6: memref<1x8x128xf32, #tpu.memory_space<vmem>>) attributes {dimension_semantics = [#tpu.dimension_semantics<parallel>], iteration_bounds = array<i64: 2>, scalar_prefetch = 0 : i64, scratch_operands = 0 : i64, tpu.core_type = #tpu.core_type<tc>, window_params = [{transform_indices = @transform_0, window_bounds = array<i64: 1, 32, 256>}, {pipeline_mode = #tpu.pipeline_mode<synchronous>, transform_indices = @transform_1, window_bounds = array<i64: 8, 32>}, {pipeline_mode = #tpu.pipeline_mode<synchronous>, transform_indices = @transform_2, window_bounds = array<i64: 128, 32>}, {pipeline_mode = #tpu.pipeline_mode<synchronous>, transform_indices = @transform_3, window_bounds = array<i64: 1, 128>}, {pipeline_mode = #tpu.pipeline_mode<synchronous>, transform_indices = @transform_4, window_bounds = array<i64: 1, 128>}, {transform_indices = @transform_5, window_bounds = array<i64: 1, 8, 128>}]} {
    %c0 = arith.constant 0 : index
    %c0_0 = arith.constant 0 : index
    %0 = vector.load %arg2[%c0, %c0_0] : memref<8x32xf32, #tpu.memory_space<vmem>>, vector<8x32xf32>
    %c0_1 = arith.constant 0 : index
    %c0_2 = arith.constant 0 : index
    %c0_3 = arith.constant 0 : index
    %1 = vector.load %arg1[%c0_1, %c0_2, %c0_3] : memref<1x32x256xf32, #tpu.memory_space<vmem>>, vector<1x32x256xf32>
    %2 = vector.shape_cast %1 : vector<1x32x256xf32> to vector<32x256xf32>
    %cst = arith.constant dense<0.000000e+00> : vector<8x256xf32>
    %3 = tpu.matmul %0, %2, %cst {dimension_numbers = #tpu.dot_dimension_numbers<[1], [0], [0], [1], [0, 0, 1, 1], [], []>} : vector<8x32xf32>, vector<32x256xf32>, vector<8x256xf32> -> vector<8x256xf32>
    %cst_4 = arith.constant dense<0xFF800000> : vector<8xf32>
    %4 = vector.multi_reduction <maximumf>, %3, %cst_4 [1] : vector<8x256xf32> to vector<8xf32>
    %5 = vector.shape_cast %4 : vector<8xf32> to vector<8x1xf32>
    %6 = vector.broadcast %5 : vector<8x1xf32> to vector<8x256xf32>
    %7 = arith.subf %3, %6 : vector<8x256xf32>
    %8 = math.exp %7 : vector<8x256xf32>
    %cst_5 = arith.constant dense<0.000000e+00> : vector<8xf32>
    %9 = vector.multi_reduction <add>, %8, %cst_5 [1] : vector<8x256xf32> to vector<8xf32>
    %10 = vector.shape_cast %9 : vector<8xf32> to vector<8x1xf32>
    %11 = vector.broadcast %10 : vector<8x1xf32> to vector<8x256xf32>
    %12 = arith.divf %8, %11 : vector<8x256xf32>
    %cst_6 = arith.constant dense<0.000000e+00> : vector<8x32xf32>
    %13 = tpu.matmul %12, %2, %cst_6 {dimension_numbers = #tpu.dot_dimension_numbers<[1], [1], [0], [0], [0, 0, 1, 0], [], []>} : vector<8x256xf32>, vector<32x256xf32>, vector<8x32xf32> -> vector<8x32xf32>
    %c0_7 = arith.constant 0 : index
    %c0_8 = arith.constant 0 : index
    %14 = vector.load %arg3[%c0_7, %c0_8] : memref<128x32xf32, #tpu.memory_space<vmem>>, vector<128x32xf32>
    %cst_9 = arith.constant dense<0.000000e+00> : vector<8x128xf32>
    %15 = tpu.matmul %13, %14, %cst_9 {dimension_numbers = #tpu.dot_dimension_numbers<[1], [1], [0], [0], [0, 0, 1, 0], [], []>} : vector<8x32xf32>, vector<128x32xf32>, vector<8x128xf32> -> vector<8x128xf32>
    %cst_10 = arith.constant dense<0.000000e+00> : vector<8xf32>
    %16 = vector.multi_reduction <add>, %15, %cst_10 [1] : vector<8x128xf32> to vector<8xf32>
    %17 = vector.shape_cast %16 : vector<8xf32> to vector<8x1xf32>
    %cst_11 = arith.constant 1.280000e+02 : f32
    %18 = vector.broadcast %cst_11 : f32 to vector<8x1xf32>
    %19 = arith.divf %17, %18 : vector<8x1xf32>
    %20 = vector.broadcast %19 : vector<8x1xf32> to vector<8x128xf32>
    %21 = arith.subf %15, %20 : vector<8x128xf32>
    %22 = arith.mulf %21, %21 : vector<8x128xf32>
    %cst_12 = arith.constant dense<0.000000e+00> : vector<8xf32>
    %23 = vector.multi_reduction <add>, %22, %cst_12 [1] : vector<8x128xf32> to vector<8xf32>
    %24 = vector.shape_cast %23 : vector<8xf32> to vector<8x1xf32>
    %cst_13 = arith.constant 1.280000e+02 : f32
    %25 = vector.broadcast %cst_13 : f32 to vector<8x1xf32>
    %26 = arith.divf %24, %25 : vector<8x1xf32>
    %27 = vector.broadcast %19 : vector<8x1xf32> to vector<8x128xf32>
    %28 = arith.subf %15, %27 : vector<8x128xf32>
    %cst_14 = arith.constant 9.99999974E-6 : f32
    %29 = vector.broadcast %cst_14 : f32 to vector<8x1xf32>
    %30 = arith.addf %26, %29 : vector<8x1xf32>
    %31 = math.rsqrt %30 : vector<8x1xf32>
    %32 = vector.broadcast %31 : vector<8x1xf32> to vector<8x128xf32>
    %33 = arith.mulf %28, %32 : vector<8x128xf32>
    %c0_15 = arith.constant 0 : index
    %c0_16 = arith.constant 0 : index
    %34 = vector.load %arg4[%c0_15, %c0_16] : memref<1x128xf32, #tpu.memory_space<vmem>>, vector<1x128xf32>
    %35 = vector.broadcast %34 : vector<1x128xf32> to vector<8x128xf32>
    %36 = arith.mulf %33, %35 : vector<8x128xf32>
    %c0_17 = arith.constant 0 : index
    %c0_18 = arith.constant 0 : index
    %37 = vector.load %arg5[%c0_17, %c0_18] : memref<1x128xf32, #tpu.memory_space<vmem>>, vector<1x128xf32>
    %38 = vector.broadcast %37 : vector<1x128xf32> to vector<8x128xf32>
    %39 = arith.addf %36, %38 : vector<8x128xf32>
    %40 = vector.shape_cast %39 : vector<8x128xf32> to vector<1x8x128xf32>
    %c0_19 = arith.constant 0 : index
    %c0_20 = arith.constant 0 : index
    %c0_21 = arith.constant 0 : index
    %41 = vector.load %arg6[%c0_19, %c0_20, %c0_21] : memref<1x8x128xf32, #tpu.memory_space<vmem>>, vector<1x8x128xf32>
    tpu.vector_store %arg6[%c0_19, %c0_20, %c0_21], %40 {strides = array<i32>} : memref<1x8x128xf32, #tpu.memory_space<vmem>>, vector<1x8x128xf32>,
    return
  }
  func.func @transform_0(%arg0: i32) -> (i32, i32, i32) {
    %c0_i32 = arith.constant 0 : i32
    %c0_i32_0 = arith.constant 0 : i32
    %c0_i32_1 = arith.constant 0 : i32
    return %arg0, %c0_i32, %c0_i32_0 : i32, i32, i32
  }
  func.func @transform_1(%arg0: i32) -> (i32, i32) {
    %c0_i32 = arith.constant 0 : i32
    %c0_i32_0 = arith.constant 0 : i32
    %c0_i32_1 = arith.constant 0 : i32
    return %c0_i32, %c0_i32_0 : i32, i32
  }
  func.func @transform_2(%arg0: i32) -> (i32, i32) {
    %c0_i32 = arith.constant 0 : i32
    %c0_i32_0 = arith.constant 0 : i32
    %c0_i32_1 = arith.constant 0 : i32
    return %c0_i32, %c0_i32_0 : i32, i32
  }
  func.func @transform_3(%arg0: i32) -> (i32, i32) {
    %c0_i32 = arith.constant 0 : i32
    %c0_i32_0 = arith.constant 0 : i32
    %c0_i32_1 = arith.constant 0 : i32
    return %c0_i32, %c0_i32_0 : i32, i32
  }
  func.func @transform_4(%arg0: i32) -> (i32, i32) {
    %c0_i32 = arith.constant 0 : i32
    %c0_i32_0 = arith.constant 0 : i32
    %c0_i32_1 = arith.constant 0 : i32
    return %c0_i32, %c0_i32_0 : i32, i32
  }
  func.func @transform_5(%arg0: i32) -> (i32, i32, i32) {
    %c0_i32 = arith.constant 0 : i32
    %c0_i32_0 = arith.constant 0 : i32
    %c0_i32_1 = arith.constant 0 : i32
    return %arg0, %c0_i32, %c0_i32_0 : i32, i32, i32
  }
}

module attributes {stable_mosaic.version = 11 : i64} {
  func.func @tokenizer_kernel(%arg0: i32, %arg1: memref<1x32x256xf32, #tpu.memory_space<vmem>>, %arg2: memref<8x32xf32, #tpu.memory_space<vmem>>, %arg3: memref<128x32xf32, #tpu.memory_space<vmem>>, %arg4: memref<1x128xf32, #tpu.memory_space<vmem>>, %arg5: memref<1x128xf32, #tpu.memory_space<vmem>>, %arg6: memref<1x8x128xf32, #tpu.memory_space<vmem>>) attributes {dimension_semantics = [#tpu.dimension_semantics<parallel>], iteration_bounds = array<i64: 2>, scalar_prefetch = 0 : i64, scratch_operands = 0 : i64, tpu.core_type = #tpu.core_type<tc>, window_params = [{transform_indices = @transform_0, window_bounds = array<i64: 1, 32, 256>}, {pipeline_mode = #tpu.pipeline_mode<synchronous>, transform_indices = @transform_1, window_bounds = array<i64: 8, 32>}, {pipeline_mode = #tpu.pipeline_mode<synchronous>, transform_indices = @transform_2, window_bounds = array<i64: 128, 32>}, {pipeline_mode = #tpu.pipeline_mode<synchronous>, transform_indices = @transform_3, window_bounds = array<i64: 1, 128>}, {pipeline_mode = #tpu.pipeline_mode<synchronous>, transform_indices = @transform_4, window_bounds = array<i64: 1, 128>}, {transform_indices = @transform_5, window_bounds = array<i64: 1, 8, 128>}]} {
    %c0 = arith.constant 0 : index
    %c0_0 = arith.constant 0 : index
    %0 = vector.load %arg2[%c0, %c0_0] : memref<8x32xf32, #tpu.memory_space<vmem>>, vector<8x32xf32>
    %c0_1 = arith.constant 0 : index
    %c0_2 = arith.constant 0 : index
    %c0_3 = arith.constant 0 : index
    %1 = vector.load %arg1[%c0_1, %c0_2, %c0_3] : memref<1x32x256xf32, #tpu.memory_space<vmem>>, vector<1x32x256xf32>
    %2 = vector.shape_cast %1 : vector<1x32x256xf32> to vector<32x256xf32>
    %cst = arith.constant dense<0.000000e+00> : vector<8x256xf32>
    %3 = tpu.matmul %0, %2, %cst {dimension_numbers = #tpu.dot_dimension_numbers<[1], [0], [0], [1], [0, 0, 1, 1], [], []>} : vector<8x32xf32>, vector<32x256xf32>, vector<8x256xf32> -> vector<8x256xf32>
    %cst_4 = arith.constant dense<0xFF800000> : vector<8xf32>
    %4 = vector.multi_reduction <maximumf>, %3, %cst_4 [1] : vector<8x256xf32> to vector<8xf32>
    %5 = vector.shape_cast %4 : vector<8xf32> to vector<8x1xf32>
    %6 = vector.broadcast %5 : vector<8x1xf32> to vector<8x256xf32>
    %7 = arith.subf %3, %6 : vector<8x256xf32>
    %8 = math.exp %7 : vector<8x256xf32>
    %cst_5 = arith.constant dense<0.000000e+00> : vector<8xf32>
    %9 = vector.multi_reduction <add>, %8, %cst_5 [1] : vector<8x256xf32> to vector<8xf32>
    %10 = vector.shape_cast %9 : vector<8xf32> to vector<8x1xf32>
    %11 = vector.broadcast %10 : vector<8x1xf32> to vector<8x256xf32>
    %12 = arith.divf %8, %11 : vector<8x256xf32>
    %cst_6 = arith.constant dense<0.000000e+00> : vector<8x32xf32>
    %13 = tpu.matmul %12, %2, %cst_6 {dimension_numbers = #tpu.dot_dimension_numbers<[1], [1], [0], [0], [0, 0, 1, 0], [], []>} : vector<8x256xf32>, vector<32x256xf32>, vector<8x32xf32> -> vector<8x32xf32>
    %c0_7 = arith.constant 0 : index
    %c0_8 = arith.constant 0 : index
    %14 = vector.load %arg3[%c0_7, %c0_8] : memref<128x32xf32, #tpu.memory_space<vmem>>, vector<128x32xf32>
    %cst_9 = arith.constant dense<0.000000e+00> : vector<8x128xf32>
    %15 = tpu.matmul %13, %14, %cst_9 {dimension_numbers = #tpu.dot_dimension_numbers<[1], [1], [0], [0], [0, 0, 1, 0], [], []>} : vector<8x32xf32>, vector<128x32xf32>, vector<8x128xf32> -> vector<8x128xf32>
    %cst_10 = arith.constant dense<0.000000e+00> : vector<8xf32>
    %16 = vector.multi_reduction <add>, %15, %cst_10 [1] : vector<8x128xf32> to vector<8xf32>
    %17 = vector.shape_cast %16 : vector<8xf32> to vector<8x1xf32>
    %cst_11 = arith.constant 1.280000e+02 : f32
    %18 = vector.broadcast %cst_11 : f32 to vector<8x1xf32>
    %19 = arith.divf %17, %18 : vector<8x1xf32>
    %20 = vector.broadcast %19 : vector<8x1xf32> to vector<8x128xf32>
    %21 = arith.subf %15, %20 : vector<8x128xf32>
    %22 = arith.mulf %21, %21 : vector<8x128xf32>
    %cst_12 = arith.constant dense<0.000000e+00> : vector<8xf32>
    %23 = vector.multi_reduction <add>, %22, %cst_12 [1] : vector<8x128xf32> to vector<8xf32>
    %24 = vector.shape_cast %23 : vector<8xf32> to vector<8x1xf32>
    %cst_13 = arith.constant 1.280000e+02 : f32
    %25 = vector.broadcast %cst_13 : f32 to vector<8x1xf32>
    %26 = arith.divf %24, %25 : vector<8x1xf32>
    %27 = vector.broadcast %19 : vector<8x1xf32> to vector<8x128xf32>
    %28 = arith.subf %15, %27 : vector<8x128xf32>
    %cst_14 = arith.constant 9.99999974E-6 : f32
    %29 = vector.broadcast %cst_14 : f32 to vector<8x1xf32>
    %30 = arith.addf %26, %29 : vector<8x1xf32>
    %31 = math.rsqrt %30 : vector<8x1xf32>
    %32 = vector.broadcast %31 : vector<8x1xf32> to vector<8x128xf32>
    %33 = arith.mulf %28, %32 : vector<8x128xf32>
    %c0_15 = arith.constant 0 : index
    %c0_16 = arith.constant 0 : index
    %34 = vector.load %arg4[%c0_15, %c0_16] : memref<1x128xf32, #tpu.memory_space<vmem>>, vector<1x128xf32>
    %35 = vector.broadcast %34 : vector<1x128xf32> to vector<8x128xf32>
    %36 = arith.mulf %33, %35 : vector<8x128xf32>
    %c0_17 = arith.constant 0 : index
    %c0_18 = arith.constant 0 : index
    %37 = vector.load %arg5[%c0_17, %c0_18] : memref<1x128xf32, #tpu.memory_space<vmem>>, vector<1x128xf32>
    %38 = vector.broadcast %37 : vector<1x128xf32> to vector<8x128xf32>
    %39 = arith.addf %36, %38 : vector<8x128xf32>
    %40 = vector.shape_cast %39 : vector<8x128xf32> to vector<1x8x128xf32>
    %c0_19 = arith.constant 0 : index
    %c0_20 = arith.constant 0 : index
    %c0_21 = arith.constant 0 : index
    %41 = vector.load %arg6[%c0_19, %c0_20, %c0_21] : memref<1x8x128xf32, #tpu.memory_space<vmem>>, vector<1x8x128xf32>
    tpu.vector_store %arg6[%c0_19, %c0_20, %c0_21], %40 {strides = array<i32>} : memref<1x8x128xf32, #tpu.memory_space<vmem>>, vector<1x8x128xf32>,
    return
  }
  func.func @transform_0(%arg0: i32) -> (i32, i32, i32) {
    %c0_i32 = arith.constant 0 : i32
    %c0_i32_0 = arith.constant 0 : i32
    %c0_i32_1 = arith.constant 0 : i32
    return %arg0, %c0_i32, %c0_i32_0 : i32, i32, i32
  }
  func.func @transform_1(%arg0: i32) -> (i32, i32) {
    %c0_i32 = arith.constant 0 : i32
    %c0_i32_0 = arith.constant 0 : i32
    %c0_i32_1 = arith.constant 0 : i32
    return %c0_i32, %c0_i32_0 : i32, i32
  }
  func.func @transform_2(%arg0: i32) -> (i32, i32) {
    %c0_i32 = arith.constant 0 : i32
    %c0_i32_0 = arith.constant 0 : i32
    %c0_i32_1 = arith.constant 0 : i32
    return %c0_i32, %c0_i32_0 : i32, i32
  }
  func.func @transform_3(%arg0: i32) -> (i32, i32) {
    %c0_i32 = arith.constant 0 : i32
    %c0_i32_0 = arith.constant 0 : i32
    %c0_i32_1 = arith.constant 0 : i32
    return %c0_i32, %c0_i32_0 : i32, i32
  }
  func.func @transform_4(%arg0: i32) -> (i32, i32) {
    %c0_i32 = arith.constant 0 : i32
    %c0_i32_0 = arith.constant 0 : i32
    %c0_i32_1 = arith.constant 0 : i32
    return %c0_i32, %c0_i32_0 : i32, i32
  }
  func.func @transform_5(%arg0: i32) -> (i32, i32, i32) {
    %c0_i32 = arith.constant 0 : i32
    %c0_i32_0 = arith.constant 0 : i32
    %c0_i32_1 = arith.constant 0 : i32
    return %arg0, %c0_i32, %c0_i32_0 : i32, i32, i32
  }
}

</mosaic_0001>

<bundles_post_ra>
// kernel: tpu_custom_call.1
= control target key start
LH: loop header
LB: loop body
LE: loop exit
PB: predicated region body
PF: predicated region fallthrough
CT: control target
= control target key end

     0   :  { %10 = vsyncpa [#allocation3], 0  ;;  %s1094_s0 = inlined_call_operand.vmem [shape: f32[2,32,256], index: 0, kind: input, shape index: {}]   ;;  %s1095_s1 = inlined_call_operand.vmem [shape: f32[8,32], index: 1, kind: input, shape index: {}]   ;;  %s1096_s2 = inlined_call_operand.vmem [shape: f32[128,32], index: 2, kind: input, shape index: {}]   ;;  %s1097_s3 = inlined_call_operand.vmem [shape: f32[1,128], index: 3, kind: input, shape index: {}]   ;;  %s1098_s4 = inlined_call_operand.vmem [shape: f32[1,128], index: 4, kind: input, shape index: {}]   ;;  %s1099_s5 = inlined_call_operand.hbm [shape: f32[2,8,128], index: 5, kind: output, shape index: {}]  }
   0x1   :  { %12 = vsyncpa [#allocation3 + $0x1], 0  ;;  %s911_s18 = smov 0   ;;  %s913_s19 = smov 0  }
   0x2   :  { %s915_s20 = smov 0   ;;  %s917_s21 = smov 0  }
   0x3 LB: > { %s932_s22 = sadd.s32 4294967295, %s875_s21   ;;  %s631_s23 = sadd.s32 4294967294, %s875_s21   ;;  %s875_s21 = sphi %s917_s21, %s1107_s21   ;;  %s871_s20 = sphi %s915_s20, %s1106_s20   ;;  %s867_s19 = sphi %s913_s19, %s1105_s19   ;;  %s863_s18 = sphi %s911_s18, %s1104_s18  }
   0x4   : > { %s936_s24 = sadd.s32 1, %s875_s21   ;;  %s135_s25 = sadd.s32 1, %s871_s20 }
   0x5   : > { %s132_s26 = ssub.s32 %s875_s21, %s936_s24  ;;  %p145_p0 = scmp.ne.s32.totalorder %s871_s20, %s867_s19 }
   0x6   : > { %p133_p1 = scmp.eq.s32.totalorder %s132_s26, 0  ;;  %p146_p2 = scmp.eq.s32.totalorder %s932_s22, 1 }
   0x7   : > { %p151_p3 = scmp.ne.s32.totalorder %s867_s19, %s863_s18  ;;  %p152_p4 = scmp.eq.s32.totalorder %s631_s23, 1 }
   0x8   : > { %s947_s27 = scalar_select %p133_p1, %s871_s20, %s135_s25  }
   0x9   : > { %p949_p5 = por %p146_p2, %p145_p0  ;;  %p953_p6 = por %p152_p4, %p151_p3 }
   0xa   : > { %p634_p7 = scmp.ge.s32.totalorder %s875_s21, 1  ;;  %p190_p8 = scmp.lt.s32.totalorder %s875_s21, 3 }
   0xc   : > { %p191_p9 = pnand %p634_p7, %p190_p8 }
   0xd   : > { %p218_p10 = scmp.lt.s32.totalorder (!%p191_p9), %s932_s22, 1  ;;  %v877_v0 = vmov (!%p191_p9), 0.0   ;;  %v223_v13 = vld [vmem:[%s1095_s1] sm:$0xff] (!%p191_p9)  ;;  %vm232_vm0 = vcmask (!%p191_p9), 261120   ;;  %v393_v27 = vld [vmem:[%s1096_s2 + $0x8] sm:$0xff] (!%p191_p9)  ;;  %v878_v28 = vmov (!%p191_p9), 0.0|0.0  }
   0xe   : > { %194 = sbr.rel (%p191_p9) target bundleno = 1316 (0x524), region = 40  ;;  %300 = vmatprep.mubr.f32.mxu1 (!%p191_p9), %v877_v0  ;;  %vm971_vm1 = vmpackc.low (!%p191_p9), %vm232_vm0, %vm232_vm0  ;;  %v392_v26 = vld [vmem:[%s1096_s2] sm:$0xff] (!%p191_p9)  ;;  %731 = vmatprep.subr.bf16.mxu0 (!%p191_p9), %v878_v28  ;;  %v394_v30 = vld [vmem:[%s1096_s2 + $0x10] sm:$0xff] (!%p191_p9)  ;;  %vm879_vm2 = vmmov (!%p191_p9), 0   ;;  %s215_s12 = sand.u32 (!%p191_p9), 1, %s867_s19  }
   0xf   : > { %v732_v29 = vpack.c.bf16 (!%p191_p9), %v393_v27, %v392_v26  ;;  %v395_v31 = vld [vmem:[%s1096_s2 + $0x18] sm:$0xff] (!%p191_p9)  ;;  %v396_v33 = vld [vmem:[%s1096_s2 + $0x20] sm:$0xff] (!%p191_p9)  ;;  %v397_v34 = vld [vmem:[%s1096_s2 + $0x28] sm:$0xff] (!%p191_p9)  ;;  %712 = vmatprep.mubr.msk.f32.mxu0 (!%p191_p9), %vm879_vm2, %v877_v0  ;;  %s635_s13 = sshll.u32 (!%p191_p9), %s215_s12, 3  ;;  %s659_s23 = sshll.u32 (!%p191_p9), %s932_s22, 7 }
  0x10   : > { %v736_v32 = vpack.c.bf16 (!%p191_p9), %v395_v31, %v394_v30  ;;  %v740_v35 = vpack.c.bf16 (!%p191_p9), %v397_v34, %v396_v33  ;;  %v398_v36 = vld [vmem:[%s1096_s2 + $0x30] sm:$0xff] (!%p191_p9)  ;;  %v399_v37 = vld [vmem:[%s1096_s2 + $0x38] sm:$0xff] (!%p191_p9)  ;;  %v400_v39 = vld [vmem:[%s1096_s2 + $0x40] sm:$0xff] (!%p191_p9)  ;;  %s217_s25 = scalar_lea.vmem (!%p191_p9), [#allocation2], %s635_s13  ;;  %s1052_s7 = scalar_lea.hbm (!%p191_p9), %s1099_s5, %s659_s23 }
  0x11   : > { %734 = vmatpush3.bf16.xpose.msk.msra.mxu0 (!%p191_p9), %vm971_vm1, %v732_v29  ;;  %v744_v38 = vpack.c.bf16 (!%p191_p9), %v399_v37, %v398_v36  ;;  %v401_v40 = vld [vmem:[%s1096_s2 + $0x48] sm:$0xff] (!%p191_p9)  ;;  %v402_v42 = vld [vmem:[%s1096_s2 + $0x50] sm:$0xff] (!%p191_p9)  ;;  %v403_v43 = vld [vmem:[%s1096_s2 + $0x58] sm:$0xff] (!%p191_p9)  ;;  %s572_s26 = sshll.u32 (!%p191_p9), %s217_s25, 4  ;;  %s559_s8 = scalar_lea.sflag (!%p191_p9), [#allocation3], %s215_s12  ;;  %s1054_s26 = int_to_ptr.vmem [resolvable:$true] %s572_s26 }
  0x12   : > { %735 = vmatprep.subr.bf16.mxu0 (!%p191_p9), %v878_v28  ;;  %v748_v41 = vpack.c.bf16 (!%p191_p9), %v401_v40, %v400_v39  ;;  %v752_v44 = vpack.c.bf16 (!%p191_p9), %v403_v43, %v402_v42  ;;  %v404_v45 = vld [vmem:[%s1096_s2 + $0x60] sm:$0xff] (!%p191_p9)  ;;  %v405_v46 = vld [vmem:[%s1096_s2 + $0x68] sm:$0xff] (!%p191_p9)  ;;  %v406_v48 = vld [vmem:[%s1096_s2 + $0x70] sm:$0xff] (!%p191_p9) }
  0x13   : > { %v756_v47 = vpack.c.bf16 (!%p191_p9), %v405_v46, %v404_v45  ;;  %v407_v49 = vld [vmem:[%s1096_s2 + $0x78] sm:$0xff] (!%p191_p9) }
  0x14   : > { %v760_v50 = vpack.c.bf16 (!%p191_p9), %v407_v49, %v406_v48 }
  0x15   : > { %s219_s30 = scalar_select %p218_p10, %s932_s22, 1 }
  0x16   : > { %s880_s22 = smov [#allocation2]  }
  0x17   : > { %s662_s6 = sshll.u32 %s219_s30, 6  ;;  %s817_s10 = sshll.u32 %s880_s22, 4  ;;  %s818_s10 = int_to_ptr.vmem [resolvable:$false] %s817_s10 }
  0x18   : > { %s222_s9 = scalar_lea.vmem %s1094_s0, %s662_s6  ;;  %s819_s11 = scalar_lea.vmem %s818_s10, 256 }
  0x19   : > { %v225_v1 = vld [vmem:[%s222_s9 + $0x8] sm:$0xff]  ;;  %v227_v2 = vld [vmem:[%s222_s9 + $0x18] sm:$0xff]  ;;  %v224_v3 = vld [vmem:[%s222_s9] sm:$0xff]  ;;  %738 = vmatpush3.bf16.xpose.msk.msra.mxu0 %vm971_vm1, %v736_v32  ;;  %p820_p0 = scmp.lt.s32.totalorder %s1054_s26, %s818_s10 }
  0x1a   : > { %v715_v4 = vpack.c.bf16 %v227_v2, %v225_v1  ;;  %v226_v5 = vld [vmem:[%s222_s9 + $0x10] sm:$0xff]  ;;  %v229_v6 = vld [vmem:[%s222_s9 + $0x28] sm:$0xff]  ;;  %v231_v7 = vld [vmem:[%s222_s9 + $0x38] sm:$0xff]  ;;  %739 = vmatprep.subr.bf16.mxu0 %v878_v28 }
  0x1b   : > { %v717_v8 = vpack.c.bf16 %v226_v5, %v224_v3  ;;  %v719_v9 = vpack.c.bf16 %v231_v7, %v229_v6  ;;  %v228_v10 = vld [vmem:[%s222_s9 + $0x20] sm:$0xff]  ;;  %v230_v11 = vld [vmem:[%s222_s9 + $0x30] sm:$0xff]  ;;  %s813_s9 = scalar_lea.vmem %s1054_s26, 128 }
  0x1c   : > { %716 = vmatprep.subr.bf16.mxu1 %v715_v4  ;;  %v721_v12 = vpack.c.bf16 %v230_v11, %v228_v10  ;;  %v656_v3 = vld [vmem:[%s1097_s3] ss:$0 sm:$0xff]  ;;  %p814_p11 = scmp.ne.s32.totalorder %s1054_s26, %s813_s9  ;;  %p821_p1 = scmp.lt.s32.totalorder %s819_s11, %s813_s9 }
  0x1d   : > { %718 = vmatpush1.bf16.msra.mxu1 %v717_v8  ;;  %v657_v5 = vld [vmem:[%s1098_s4] ss:$0 sm:$0xff] }
  0x1e   : > { %720 = vmatprep.subr.bf16.mxu1 %v719_v9  ;;  %p815_p12 = pnand %p814_p11, %p949_p5  ;;  %p822_p2 = por %p821_p1, %p820_p0 }
  0x20   : > { %p816_p13 = pneg %p815_p12 }
  0x21   : > { %722 = vmatpush1.bf16.msra.mxu1 %v721_v12  ;;  %742 = vmatpush3.bf16.xpose.msk.msra.mxu0 %vm971_vm1, %v740_v35 }
  0x22   : > { %724 = vmatprep.subr.bf16.mxu1 %v715_v4  ;;  %743 = vmatprep.subr.bf16.mxu0 %v878_v28  ;;  %p823_p3 = pnand %p822_p2, %p816_p13 }
  0x24   : > { %638 = vmatmul.mubr.msk.f32.vlgmr.msra.gmra.mrb[0].mxu1 %vm232_vm0, %v223_v13 }
  0x29   : > { %746 = vmatpush3.bf16.xpose.msk.msra.mxu0 %vm971_vm1, %v744_v38 }
  0x2a   : > { %726 = vmatpush1.bf16.xpose.msra.mxu1 %v717_v8  ;;  %747 = vmatprep.subr.bf16.mxu0 %v878_v28 }
  0x2b   : > { %728 = vmatprep.subr.bf16.mxu1 %v719_v9 }
  0x31   : > { %750 = vmatpush3.bf16.xpose.msk.msra.mxu0 %vm971_vm1, %v748_v41 }
  0x32   : > { %730 = vmatpush1.bf16.xpose.msra.mxu1 %v721_v12  ;;  %751 = vmatprep.subr.bf16.mxu0 %v878_v28 }
  0x39   : > { %754 = vmatpush3.bf16.xpose.msk.msra.mxu0 %vm971_vm1, %v752_v44 }
  0x3a   : > { %755 = vmatprep.subr.bf16.mxu0 %v878_v28 }
  0x41   : > { %758 = vmatpush3.bf16.xpose.msk.msra.mxu0 %vm971_vm1, %v756_v47 }
  0x42   : > { %759 = vmatprep.subr.bf16.mxu0 %v878_v28 }
  0x49   : > { %762 = vmatpush3.bf16.xpose.msk.msra.mxu0 %vm971_vm1, %v760_v50 }
  0xf7   : > { %v302_v14 = vpop.f32.mrb[0].mxu1 }
  0xf8   : > { %v304_v15 = vpop.f32.mrb[1].mxu1 }
  0xf9   : > { %v307_v16 = vmax.f32 %v302_v14, %v304_v15 }
  0xfb   : > { %308 = vmax.xlane.f32.xlu0 %v307_v16 }
 0x188   : > { %v309_v17 = vpop.xlane.xlu0 %308 }
 0x189   : > { %v310_v18 = vsub.f32 %v302_v14, %v309_v17  ;;  %v311_v19 = vsub.f32 %v304_v15, %v309_v17 }
 0x18b   : > { %v312_v20 = vmul.f32 1.442695, %v310_v18  ;;  %v314_v21 = vmul.f32 1.442695, %v311_v19 }
 0x18d   : > { %805 = vpow2.f32 %v312_v20 }
 0x18e   : > { %807 = vpow2.f32 %v314_v21 }
 0x197   : > { %v806_v22 = vpop.eup %805 }
 0x198   : > { %v808_v23 = vpop.eup %807 }
 0x199   : > { %v316_v24 = vadd.f32 %v808_v23, %v806_v22 }
 0x19b   : > { %317 = vadd.xlane.f32.xlu0 %v316_v24 }
 0x228   : > { %v318_v51 = vpop.xlane.xlu0 %317 }
 0x229   : > { %809 = vrcp.f32 %v318_v51 }
 0x233   : > { %v810_v52 = vpop.eup %809 }
 0x234   : > { %v321_v53 = vmul.f32 %v810_v52, %v808_v23  ;;  %v320_v54 = vmul.f32 %v810_v52, %v806_v22 }
 0x236   : > { %386 = vmatprep.mubr.f32.mxu1 %v321_v53 }
 0x237   : > { %387 = vmatmul.mubr.f32.vlgmr.msra.gmra.mrb[2].mxu1 %v320_v54 }
 0x30a   : > { %v388_v55 = vpop.f32.mrb[2].mxu1 }
 0x30b   : > { %v390_v56 = vpop.f32.mrb[3].mxu1  ;;  %713 = vmatmul.mubr.msk.f32.vlgmr.msra.gmra.mrb[0].mxu0 %vm232_vm0, %v388_v55 }
 0x3de   : > { %v525_v57 = vpop.f32.mrb[0].mxu0 }
 0x3df   : > { %529 = vadd.xlane.f32.xlu1 %v525_v57  ;;  %v714_v58 = vpop.f32.mrb[1].mxu0 }
 0x46c   : > { %v530_v59 = vpop.xlane.xlu1 %529 }
 0x46d   : > { %v532_v60 = vmul.f32 0.0078125, %v530_v59 }
 0x46f   : > { %v533_v61 = vsub.f32 %v525_v57, %v532_v60 }
 0x471   : > { %v534_v62 = vmul.f32 %v533_v61, %v533_v61 }
 0x473   : > { %535 = vadd.xlane.f32.xlu1 %v534_v62 }
 0x500   : > { %v536_v63 = vpop.xlane.xlu1 %535 }
 0x501   : > { %v537_v1 = vmul.f32 0.0078125, %v536_v63 }
 0x503   : > { %v538_v2 = vadd.f32 1e-05, %v537_v1 }
 0x505   : > { %811 = vrsqrt.f32 %v538_v2 }
 0x50f   : > { %v812_v0 = vpop.eup %811 }
 0x510   : > { %v540_v4 = vmul.f32 %v812_v0, %v533_v61 }
 0x512   : > { %v548_v6 = vmul.f32 %v656_v3, %v540_v4 }
 0x514   : > { %v556_v7 = vadd.f32 %v657_v5, %v548_v6 }
 0x516   : > { %557 = vst [vmem:[%s217_s25] sm:$0xff] %v556_v7 }
 0x517   : > { %826 = shalt.err (!%p823_p3)
}
 0x518   : > { %s827_s12 = scalar_lea.hbm %s1052_s7, 128  ;;  %s831_s15 = scalar_lea.hbm %s1099_s5, 256 }
 0x519   : > { %p828_p4 = scmp.ne.s32.totalorder %s1052_s7, %s827_s12  ;;  %p832_p9 = scmp.lt.u32.totalorder %s1052_s7, %s1099_s5 }
 0x51a   : > { %p833_p10 = scmp.lt.u32.totalorder %s831_s15, %s827_s12  ;;  %p835_p12 = scmp.lt.u32.totalorder %s827_s12, %s1052_s7 }
 0x51b   : > { %p829_p7 = pnand %p828_p4, %p949_p5 }
 0x51c   : > { %p834_p11 = por %p833_p10, %p832_p9 }
 0x51d   : > { %p830_p8 = pneg %p829_p7 }
 0x51e   : > { %p836_p13 = por %p835_p12, %p834_p11 }
 0x520   : > { %p837_p0 = pnand %p836_p13, %p830_p8 }
 0x522   : > { %840 = shalt.err (!%p837_p0)
}
 0x523   : > { %763 = dma.vmem_to_hbm [thread:$0]  (%p949_p5), %s1054_s26, 128, %s1052_s7, %s559_s8  }
 0x524 PF: > { %p769_p1 = scmp.ge.s32.totalorder %s875_s21, 2  ;;  %s584_s23 = sand.u32 1, %s863_s18  }
 0x525   : > { %s585_s25 = scalar_lea.sflag [#allocation3], %s584_s23 }
 0x526   : > { %p766_p2 = pnand %p769_p1, %p953_p6 }
 0x528   : > { %858 = dma.done.wait (!%p766_p2), %s585_s25, 128  }
 0x529   : > { %860 = vsyncadd (!%p766_p2), %s585_s25, 4294967168  ;;  %p15_p3 = scmp.ge.s32.totalorder %s936_s24, 4   ;;  %s1104_s18 = smov %s867_s19 }
 0x52a   : > { %s1105_s19 = smov %s871_s20  ;;  %s1106_s20 = smov %s947_s27 }
 0x52b   : > { %s1107_s21 = smov %s936_s24  ;;  %17 = sbr.rel (!%p15_p3) target bundleno = 3 (0x3), region = 75 }
 0x532   :  { %590 = vsyncpa [#allocation3], 1 }
 0x533   :  { %592 = vsyncpa [#allocation3 + $0x1], 1 }

// kernel: tpu_custom_call.1
= control target key start
LH: loop header
LB: loop body
LE: loop exit
PB: predicated region body
PF: predicated region fallthrough
CT: control target
= control target key end

     0   :  { %10 = vsyncpa [#allocation3], 0  ;;  %s1094_s0 = inlined_call_operand.vmem [shape: f32[2,32,256], index: 0, kind: input, shape index: {}]   ;;  %s1095_s1 = inlined_call_operand.vmem [shape: f32[8,32], index: 1, kind: input, shape index: {}]   ;;  %s1096_s2 = inlined_call_operand.vmem [shape: f32[128,32], index: 2, kind: input, shape index: {}]   ;;  %s1097_s3 = inlined_call_operand.vmem [shape: f32[1,128], index: 3, kind: input, shape index: {}]   ;;  %s1098_s4 = inlined_call_operand.vmem [shape: f32[1,128], index: 4, kind: input, shape index: {}]   ;;  %s1099_s5 = inlined_call_operand.hbm [shape: f32[2,8,128], index: 5, kind: output, shape index: {}]  }
   0x1   :  { %12 = vsyncpa [#allocation3 + $0x1], 0  ;;  %s911_s18 = smov 0   ;;  %s913_s19 = smov 0  }
   0x2   :  { %s915_s20 = smov 0   ;;  %s917_s21 = smov 0  }
   0x3 LB: > { %s932_s22 = sadd.s32 4294967295, %s875_s21   ;;  %s631_s23 = sadd.s32 4294967294, %s875_s21   ;;  %s875_s21 = sphi %s917_s21, %s1107_s21   ;;  %s871_s20 = sphi %s915_s20, %s1106_s20   ;;  %s867_s19 = sphi %s913_s19, %s1105_s19   ;;  %s863_s18 = sphi %s911_s18, %s1104_s18  }
   0x4   : > { %s936_s24 = sadd.s32 1, %s875_s21   ;;  %s135_s25 = sadd.s32 1, %s871_s20 }
   0x5   : > { %s132_s26 = ssub.s32 %s875_s21, %s936_s24  ;;  %p145_p0 = scmp.ne.s32.totalorder %s871_s20, %s867_s19 }
   0x6   : > { %p133_p1 = scmp.eq.s32.totalorder %s132_s26, 0  ;;  %p146_p2 = scmp.eq.s32.totalorder %s932_s22, 1 }
   0x7   : > { %p151_p3 = scmp.ne.s32.totalorder %s867_s19, %s863_s18  ;;  %p152_p4 = scmp.eq.s32.totalorder %s631_s23, 1 }
   0x8   : > { %s947_s27 = scalar_select %p133_p1, %s871_s20, %s135_s25  }
   0x9   : > { %p949_p5 = por %p146_p2, %p145_p0  ;;  %p953_p6 = por %p152_p4, %p151_p3 }
   0xa   : > { %p634_p7 = scmp.ge.s32.totalorder %s875_s21, 1  ;;  %p190_p8 = scmp.lt.s32.totalorder %s875_s21, 3 }
   0xc   : > { %p191_p9 = pnand %p634_p7, %p190_p8 }
   0xd   : > { %p218_p10 = scmp.lt.s32.totalorder (!%p191_p9), %s932_s22, 1  ;;  %v877_v0 = vmov (!%p191_p9), 0.0   ;;  %v223_v13 = vld [vmem:[%s1095_s1] sm:$0xff] (!%p191_p9)  ;;  %vm232_vm0 = vcmask (!%p191_p9), 261120   ;;  %v393_v27 = vld [vmem:[%s1096_s2 + $0x8] sm:$0xff] (!%p191_p9)  ;;  %v878_v28 = vmov (!%p191_p9), 0.0|0.0  }
   0xe   : > { %194 = sbr.rel (%p191_p9) target bundleno = 1316 (0x524), region = 40  ;;  %300 = vmatprep.mubr.f32.mxu1 (!%p191_p9), %v877_v0  ;;  %vm971_vm1 = vmpackc.low (!%p191_p9), %vm232_vm0, %vm232_vm0  ;;  %v392_v26 = vld [vmem:[%s1096_s2] sm:$0xff] (!%p191_p9)  ;;  %731 = vmatprep.subr.bf16.mxu0 (!%p191_p9), %v878_v28  ;;  %v394_v30 = vld [vmem:[%s1096_s2 + $0x10] sm:$0xff] (!%p191_p9)  ;;  %vm879_vm2 = vmmov (!%p191_p9), 0   ;;  %s215_s12 = sand.u32 (!%p191_p9), 1, %s867_s19  }
   0xf   : > { %v732_v29 = vpack.c.bf16 (!%p191_p9), %v393_v27, %v392_v26  ;;  %v395_v31 = vld [vmem:[%s1096_s2 + $0x18] sm:$0xff] (!%p191_p9)  ;;  %v396_v33 = vld [vmem:[%s1096_s2 + $0x20] sm:$0xff] (!%p191_p9)  ;;  %v397_v34 = vld [vmem:[%s1096_s2 + $0x28] sm:$0xff] (!%p191_p9)  ;;  %712 = vmatprep.mubr.msk.f32.mxu0 (!%p191_p9), %vm879_vm2, %v877_v0  ;;  %s635_s13 = sshll.u32 (!%p191_p9), %s215_s12, 3  ;;  %s659_s23 = sshll.u32 (!%p191_p9), %s932_s22, 7 }
  0x10   : > { %v736_v32 = vpack.c.bf16 (!%p191_p9), %v395_v31, %v394_v30  ;;  %v740_v35 = vpack.c.bf16 (!%p191_p9), %v397_v34, %v396_v33  ;;  %v398_v36 = vld [vmem:[%s1096_s2 + $0x30] sm:$0xff] (!%p191_p9)  ;;  %v399_v37 = vld [vmem:[%s1096_s2 + $0x38] sm:$0xff] (!%p191_p9)  ;;  %v400_v39 = vld [vmem:[%s1096_s2 + $0x40] sm:$0xff] (!%p191_p9)  ;;  %s217_s25 = scalar_lea.vmem (!%p191_p9), [#allocation2], %s635_s13  ;;  %s1052_s7 = scalar_lea.hbm (!%p191_p9), %s1099_s5, %s659_s23 }
  0x11   : > { %734 = vmatpush3.bf16.xpose.msk.msra.mxu0 (!%p191_p9), %vm971_vm1, %v732_v29  ;;  %v744_v38 = vpack.c.bf16 (!%p191_p9), %v399_v37, %v398_v36  ;;  %v401_v40 = vld [vmem:[%s1096_s2 + $0x48] sm:$0xff] (!%p191_p9)  ;;  %v402_v42 = vld [vmem:[%s1096_s2 + $0x50] sm:$0xff] (!%p191_p9)  ;;  %v403_v43 = vld [vmem:[%s1096_s2 + $0x58] sm:$0xff] (!%p191_p9)  ;;  %s572_s26 = sshll.u32 (!%p191_p9), %s217_s25, 4  ;;  %s559_s8 = scalar_lea.sflag (!%p191_p9), [#allocation3], %s215_s12  ;;  %s1054_s26 = int_to_ptr.vmem [resolvable:$true] %s572_s26 }
  0x12   : > { %735 = vmatprep.subr.bf16.mxu0 (!%p191_p9), %v878_v28  ;;  %v748_v41 = vpack.c.bf16 (!%p191_p9), %v401_v40, %v400_v39  ;;  %v752_v44 = vpack.c.bf16 (!%p191_p9), %v403_v43, %v402_v42  ;;  %v404_v45 = vld [vmem:[%s1096_s2 + $0x60] sm:$0xff] (!%p191_p9)  ;;  %v405_v46 = vld [vmem:[%s1096_s2 + $0x68] sm:$0xff] (!%p191_p9)  ;;  %v406_v48 = vld [vmem:[%s1096_s2 + $0x70] sm:$0xff] (!%p191_p9) }
  0x13   : > { %v756_v47 = vpack.c.bf16 (!%p191_p9), %v405_v46, %v404_v45  ;;  %v407_v49 = vld [vmem:[%s1096_s2 + $0x78] sm:$0xff] (!%p191_p9) }
  0x14   : > { %v760_v50 = vpack.c.bf16 (!%p191_p9), %v407_v49, %v406_v48 }
  0x15   : > { %s219_s30 = scalar_select %p218_p10, %s932_s22, 1 }
  0x16   : > { %s880_s22 = smov [#allocation2]  }
  0x17   : > { %s662_s6 = sshll.u32 %s219_s30, 6  ;;  %s817_s10 = sshll.u32 %s880_s22, 4  ;;  %s818_s10 = int_to_ptr.vmem [resolvable:$false] %s817_s10 }
  0x18   : > { %s222_s9 = scalar_lea.vmem %s1094_s0, %s662_s6  ;;  %s819_s11 = scalar_lea.vmem %s818_s10, 256 }
  0x19   : > { %v225_v1 = vld [vmem:[%s222_s9 + $0x8] sm:$0xff]  ;;  %v227_v2 = vld [vmem:[%s222_s9 + $0x18] sm:$0xff]  ;;  %v224_v3 = vld [vmem:[%s222_s9] sm:$0xff]  ;;  %738 = vmatpush3.bf16.xpose.msk.msra.mxu0 %vm971_vm1, %v736_v32  ;;  %p820_p0 = scmp.lt.s32.totalorder %s1054_s26, %s818_s10 }
  0x1a   : > { %v715_v4 = vpack.c.bf16 %v227_v2, %v225_v1  ;;  %v226_v5 = vld [vmem:[%s222_s9 + $0x10] sm:$0xff]  ;;  %v229_v6 = vld [vmem:[%s222_s9 + $0x28] sm:$0xff]  ;;  %v231_v7 = vld [vmem:[%s222_s9 + $0x38] sm:$0xff]  ;;  %739 = vmatprep.subr.bf16.mxu0 %v878_v28 }
  0x1b   : > { %v717_v8 = vpack.c.bf16 %v226_v5, %v224_v3  ;;  %v719_v9 = vpack.c.bf16 %v231_v7, %v229_v6  ;;  %v228_v10 = vld [vmem:[%s222_s9 + $0x20] sm:$0xff]  ;;  %v230_v11 = vld [vmem:[%s222_s9 + $0x30] sm:$0xff]  ;;  %s813_s9 = scalar_lea.vmem %s1054_s26, 128 }
  0x1c   : > { %716 = vmatprep.subr.bf16.mxu1 %v715_v4  ;;  %v721_v12 = vpack.c.bf16 %v230_v11, %v228_v10  ;;  %v656_v3 = vld [vmem:[%s1097_s3] ss:$0 sm:$0xff]  ;;  %p814_p11 = scmp.ne.s32.totalorder %s1054_s26, %s813_s9  ;;  %p821_p1 = scmp.lt.s32.totalorder %s819_s11, %s813_s9 }
  0x1d   : > { %718 = vmatpush1.bf16.msra.mxu1 %v717_v8  ;;  %v657_v5 = vld [vmem:[%s1098_s4] ss:$0 sm:$0xff] }
  0x1e   : > { %720 = vmatprep.subr.bf16.mxu1 %v719_v9  ;;  %p815_p12 = pnand %p814_p11, %p949_p5  ;;  %p822_p2 = por %p821_p1, %p820_p0 }
  0x20   : > { %p816_p13 = pneg %p815_p12 }
  0x21   : > { %722 = vmatpush1.bf16.msra.mxu1 %v721_v12  ;;  %742 = vmatpush3.bf16.xpose.msk.msra.mxu0 %vm971_vm1, %v740_v35 }
  0x22   : > { %724 = vmatprep.subr.bf16.mxu1 %v715_v4  ;;  %743 = vmatprep.subr.bf16.mxu0 %v878_v28  ;;  %p823_p3 = pnand %p822_p2, %p816_p13 }
  0x24   : > { %638 = vmatmul.mubr.msk.f32.vlgmr.msra.gmra.mrb[0].mxu1 %vm232_vm0, %v223_v13 }
  0x29   : > { %746 = vmatpush3.bf16.xpose.msk.msra.mxu0 %vm971_vm1, %v744_v38 }
  0x2a   : > { %726 = vmatpush1.bf16.xpose.msra.mxu1 %v717_v8  ;;  %747 = vmatprep.subr.bf16.mxu0 %v878_v28 }
  0x2b   : > { %728 = vmatprep.subr.bf16.mxu1 %v719_v9 }
  0x31   : > { %750 = vmatpush3.bf16.xpose.msk.msra.mxu0 %vm971_vm1, %v748_v41 }
  0x32   : > { %730 = vmatpush1.bf16.xpose.msra.mxu1 %v721_v12  ;;  %751 = vmatprep.subr.bf16.mxu0 %v878_v28 }
  0x39   : > { %754 = vmatpush3.bf16.xpose.msk.msra.mxu0 %vm971_vm1, %v752_v44 }
  0x3a   : > { %755 = vmatprep.subr.bf16.mxu0 %v878_v28 }
  0x41   : > { %758 = vmatpush3.bf16.xpose.msk.msra.mxu0 %vm971_vm1, %v756_v47 }
  0x42   : > { %759 = vmatprep.subr.bf16.mxu0 %v878_v28 }
  0x49   : > { %762 = vmatpush3.bf16.xpose.msk.msra.mxu0 %vm971_vm1, %v760_v50 }
  0xf7   : > { %v302_v14 = vpop.f32.mrb[0].mxu1 }
  0xf8   : > { %v304_v15 = vpop.f32.mrb[1].mxu1 }
  0xf9   : > { %v307_v16 = vmax.f32 %v302_v14, %v304_v15 }
  0xfb   : > { %308 = vmax.xlane.f32.xlu0 %v307_v16 }
 0x188   : > { %v309_v17 = vpop.xlane.xlu0 %308 }
 0x189   : > { %v310_v18 = vsub.f32 %v302_v14, %v309_v17  ;;  %v311_v19 = vsub.f32 %v304_v15, %v309_v17 }
 0x18b   : > { %v312_v20 = vmul.f32 1.442695, %v310_v18  ;;  %v314_v21 = vmul.f32 1.442695, %v311_v19 }
 0x18d   : > { %805 = vpow2.f32 %v312_v20 }
 0x18e   : > { %807 = vpow2.f32 %v314_v21 }
 0x197   : > { %v806_v22 = vpop.eup %805 }
 0x198   : > { %v808_v23 = vpop.eup %807 }
 0x199   : > { %v316_v24 = vadd.f32 %v808_v23, %v806_v22 }
 0x19b   : > { %317 = vadd.xlane.f32.xlu0 %v316_v24 }
 0x228   : > { %v318_v51 = vpop.xlane.xlu0 %317 }
 0x229   : > { %809 = vrcp.f32 %v318_v51 }
 0x233   : > { %v810_v52 = vpop.eup %809 }
 0x234   : > { %v321_v53 = vmul.f32 %v810_v52, %v808_v23  ;;  %v320_v54 = vmul.f32 %v810_v52, %v806_v22 }
 0x236   : > { %386 = vmatprep.mubr.f32.mxu1 %v321_v53 }
 0x237   : > { %387 = vmatmul.mubr.f32.vlgmr.msra.gmra.mrb[2].mxu1 %v320_v54 }
 0x30a   : > { %v388_v55 = vpop.f32.mrb[2].mxu1 }
 0x30b   : > { %v390_v56 = vpop.f32.mrb[3].mxu1  ;;  %713 = vmatmul.mubr.msk.f32.vlgmr.msra.gmra.mrb[0].mxu0 %vm232_vm0, %v388_v55 }
 0x3de   : > { %v525_v57 = vpop.f32.mrb[0].mxu0 }
 0x3df   : > { %529 = vadd.xlane.f32.xlu1 %v525_v57  ;;  %v714_v58 = vpop.f32.mrb[1].mxu0 }
 0x46c   : > { %v530_v59 = vpop.xlane.xlu1 %529 }
 0x46d   : > { %v532_v60 = vmul.f32 0.0078125, %v530_v59 }
 0x46f   : > { %v533_v61 = vsub.f32 %v525_v57, %v532_v60 }
 0x471   : > { %v534_v62 = vmul.f32 %v533_v61, %v533_v61 }
 0x473   : > { %535 = vadd.xlane.f32.xlu1 %v534_v62 }
 0x500   : > { %v536_v63 = vpop.xlane.xlu1 %535 }
 0x501   : > { %v537_v1 = vmul.f32 0.0078125, %v536_v63 }
 0x503   : > { %v538_v2 = vadd.f32 1e-05, %v537_v1 }
 0x505   : > { %811 = vrsqrt.f32 %v538_v2 }
 0x50f   : > { %v812_v0 = vpop.eup %811 }
 0x510   : > { %v540_v4 = vmul.f32 %v812_v0, %v533_v61 }
 0x512   : > { %v548_v6 = vmul.f32 %v656_v3, %v540_v4 }
 0x514   : > { %v556_v7 = vadd.f32 %v657_v5, %v548_v6 }
 0x516   : > { %557 = vst [vmem:[%s217_s25] sm:$0xff] %v556_v7 }
 0x517   : > { %826 = shalt.err (!%p823_p3)
}
 0x518   : > { %s827_s12 = scalar_lea.hbm %s1052_s7, 128  ;;  %s831_s15 = scalar_lea.hbm %s1099_s5, 256 }
 0x519   : > { %p828_p4 = scmp.ne.s32.totalorder %s1052_s7, %s827_s12  ;;  %p832_p9 = scmp.lt.u32.totalorder %s1052_s7, %s1099_s5 }
 0x51a   : > { %p833_p10 = scmp.lt.u32.totalorder %s831_s15, %s827_s12  ;;  %p835_p12 = scmp.lt.u32.totalorder %s827_s12, %s1052_s7 }
 0x51b   : > { %p829_p7 = pnand %p828_p4, %p949_p5 }
 0x51c   : > { %p834_p11 = por %p833_p10, %p832_p9 }
 0x51d   : > { %p830_p8 = pneg %p829_p7 }
 0x51e   : > { %p836_p13 = por %p835_p12, %p834_p11 }
 0x520   : > { %p837_p0 = pnand %p836_p13, %p830_p8 }
 0x522   : > { %840 = shalt.err (!%p837_p0)
}
 0x523   : > { %763 = dma.vmem_to_hbm [thread:$0]  (%p949_p5), %s1054_s26, 128, %s1052_s7, %s559_s8  }
 0x524 PF: > { %p769_p1 = scmp.ge.s32.totalorder %s875_s21, 2  ;;  %s584_s23 = sand.u32 1, %s863_s18  }
 0x525   : > { %s585_s25 = scalar_lea.sflag [#allocation3], %s584_s23 }
 0x526   : > { %p766_p2 = pnand %p769_p1, %p953_p6 }
 0x528   : > { %858 = dma.done.wait (!%p766_p2), %s585_s25, 128  }
 0x529   : > { %860 = vsyncadd (!%p766_p2), %s585_s25, 4294967168  ;;  %p15_p3 = scmp.ge.s32.totalorder %s936_s24, 4   ;;  %s1104_s18 = smov %s867_s19 }
 0x52a   : > { %s1105_s19 = smov %s871_s20  ;;  %s1106_s20 = smov %s947_s27 }
 0x52b   : > { %s1107_s21 = smov %s936_s24  ;;  %17 = sbr.rel (!%p15_p3) target bundleno = 3 (0x3), region = 75 }
 0x532   :  { %590 = vsyncpa [#allocation3], 1 }
 0x533   :  { %592 = vsyncpa [#allocation3 + $0x1], 1 }

</bundles_post_ra>
